<compile_context>
chip_gen: v7x
topology: tpu7x:2x2x1
jax: 0.10.0
libtpu: 0.0.40
codegen_flags: <defaults>
</compile_context>

<pallas_src>
import functools

import jax
import jax.numpy as jnp
from jax.experimental import pallas as pl
from jax.experimental.pallas import tpu as pltpu


def _round_up(a, m):
    return ((a + m - 1) // m) * m


def _make_pool_kernel(k, s, p, h, w, h_out, w_out, pad_val, dtype):
    """Per-block kernel.

    Block layout: x_ref (TB, h, w), o_ref (TB, h_out, w_out); W on lanes,
    H on sublanes, TB a leading dim.  h_out and k are static, so every slice
    below is a static contiguous slice and the row loop is fully unrolled.
    """

    def kernel(x_ref, o_ref):
        # Horizontal tap-selection mask, built once per block (hoisted out of
        # the row loop).  mask[ow, j] == True iff input column j falls inside
        # the pooling window of output column ow; out-of-range (padding)
        # columns are simply absent, which implements the -inf padding free.
        j_idx = jax.lax.broadcasted_iota(jnp.int32, (w_out, w), 1)
        ow_idx = jax.lax.broadcasted_iota(jnp.int32, (w_out, w), 0)
        w_start = ow_idx * s - p
        hmask = (j_idx >= w_start) & (j_idx < w_start + k)        # (w_out, w)
        neg = jnp.asarray(pad_val, dtype)

        for oh in range(h_out):                                   # static unroll
            # Vertical window, statically clipped to [0, h): dropped rows are
            # exactly the -inf padding rows, which never win the max.
            ih0 = max(0, oh * s - p)
            ih1 = min(h, oh * s - p + k)
            rows = x_ref[:, ih0:ih1, :]                           # (TB, kk, w)
            vmax = rows[:, 0, :]
            for d in range(1, ih1 - ih0):
                vmax = jnp.maximum(vmax, rows[:, d, :])           # (TB, w)

            # Horizontal pooling: masked reduce over the lane (W) axis.
            sel = jnp.where(hmask[None, :, :], vmax[:, None, :], neg)
            row_out = jnp.max(sel, axis=-1)                       # (TB, w_out)
            # TODO(synk): batch these per-row stores into one full-tile store
            # if a profile ever shows the vst slot saturating (v5e).
            o_ref[:, oh:oh + 1, :] = row_out[:, None, :].astype(o_ref.dtype)

    return kernel


@functools.partial(jax.jit, static_argnames=("kernel_size", "stride", "padding"))
def group_spatial_max_pool(x, *, kernel_size: int, stride: int, padding: int):
    """x: (N, C, G, H, W) -> (N, C, G, H_out, W_out), same as the torch module."""
    n, c, g, h, w = x.shape
    k, s, p = kernel_size, stride, padding
    b = n * c * g
    h_out = (h + 2 * p - k) // s + 1
    w_out = (w + 2 * p - k) // s + 1

    dtype = x.dtype
    if jnp.issubdtype(dtype, jnp.floating):
        pad_val = -jnp.inf
    else:
        pad_val = int(jnp.iinfo(dtype).min)

    # ---- VMEM-aware tile (TB) selection ------------------------------------
    itemsize = jnp.dtype(dtype).itemsize
    sublane = 8 * max(1, 4 // itemsize)        # f32: 8, bf16: 16, int8: 32
    lane = 128
    # Physical VMEM bytes of one batch-row of each block, including the
    # (sublane, lane) tile rounding the hardware layout imposes.
    vmem_in_row = _round_up(h, sublane) * _round_up(w, lane) * itemsize
    vmem_out_row = _round_up(h_out, sublane) * _round_up(w_out, lane) * itemsize
    vmem_tmp_row = _round_up(w_out, sublane) * _round_up(w, lane) * itemsize

    try:                                        # generation-aware budget
        phys_vmem = int(pltpu.get_tpu_info().vmem_capacity_bytes)
    except Exception:
        phys_vmem = 64 * 1024 * 1024            # conservative (v7x per-core)
    vmem_limit = min(phys_vmem * 3 // 4, 96 * 1024 * 1024)
    budget = min(phys_vmem * 2 // 5, 48 * 1024 * 1024)

    # Double-buffered input + output block plus one row's worth of the
    # horizontal-reduce temporary.
    per_row = 2 * (vmem_in_row + vmem_out_row) + vmem_tmp_row
    tb_cap = max(1, budget // per_row)
    # Also keep the per-row temporary (live vregs / spill) bounded.
    tb_cap = min(tb_cap, max(1, (4 * 1024 * 1024) // vmem_tmp_row))

    # At least ~8 grid steps when B allows: keeps both v7x TensorCores busy on
    # the single 'parallel' axis and gives the DMA pipeline >=2 in-flight
    # blocks per core; large B still gets large (tb_cap-sized) blocks.
    min_steps = min(b, 8)
    tb = max(1, min(tb_cap, pl.cdiv(b, min_steps)))
    grid = pl.cdiv(b, tb)

    x3 = x.reshape(b, h, w)                     # free leading-dim reshape

    kernel = _make_pool_kernel(k, s, p, h, w, h_out, w_out, pad_val, dtype)
    out3 = pl.pallas_call(
        kernel,
        out_shape=jax.ShapeDtypeStruct((b, h_out, w_out), dtype),
        grid=(grid,),
        in_specs=[pl.BlockSpec((tb, h, w), lambda i: (i, 0, 0))],
        out_specs=pl.BlockSpec((tb, h_out, w_out), lambda i: (i, 0, 0)),
        compiler_params=pltpu.CompilerParams(
            dimension_semantics=("parallel",),
            vmem_limit_bytes=int(vmem_limit),
        ),
    )(x3)

    return out3.reshape(n, c, g, h_out, w_out)


def _reference_pool(x, kernel_size, stride, padding):
    """Pure-JAX reference using lax.reduce_window (matches F.max_pool2d)."""
    return jax.lax.reduce_window(
        x,
        jnp.asarray(-jnp.inf, x.dtype),
        jax.lax.max,
        window_dimensions=(1, 1, 1, kernel_size, kernel_size),
        window_strides=(1, 1, 1, stride, stride),
        padding=((0, 0), (0, 0), (0, 0),
                 (padding, padding), (padding, padding)),
    )


if __name__ == "__main__":
    key = jax.random.PRNGKey(0)
    x = jax.random.normal(key, (2, 4, 3, 16, 16), dtype=jnp.float32)

    # Main config (typical GroupSpatialMaxPool(3, 2, 1)).
    out = group_spatial_max_pool(x, kernel_size=3, stride=2, padding=1)
    out = jax.block_until_ready(out)
    ref = _reference_pool(x, 3, 2, 1)
    assert out.shape == ref.shape, (out.shape, ref.shape)
    assert jnp.allclose(out, ref), "Pallas result mismatch vs reference (k=3,s=2,p=1)"

    # No-padding / non-overlapping path.
    out2 = group_spatial_max_pool(x, kernel_size=2, stride=2, padding=0)
    out2 = jax.block_until_ready(out2)
    ref2 = _reference_pool(x, 2, 2, 0)
    assert out2.shape == ref2.shape, (out2.shape, ref2.shape)
    assert jnp.allclose(out2, ref2), "Pallas result mismatch vs reference (k=2,s=2,p=0)"

    # bf16 stays bf16 end-to-end (half the HBM traffic).
    xb = x.astype(jnp.bfloat16)
    out3 = group_spatial_max_pool(xb, kernel_size=3, stride=2, padding=1)
    out3 = jax.block_until_ready(out3)
    ref3 = _reference_pool(xb, 3, 2, 1)
    assert out3.shape == ref3.shape, (out3.shape, ref3.shape)
    assert jnp.allclose(out3.astype(jnp.float32), ref3.astype(jnp.float32)), \
        "Pallas result mismatch vs reference (bf16)"

    print("KERNEL_OK")
</pallas_src>

<mosaic_0001>
module attributes {stable_mosaic.version = 11 : i64} {
  func.func @kernel(%arg0: i32, %arg1: memref<3x16x16xf32, #tpu.memory_space<vmem>>, %arg2: memref<3x8x8xf32, #tpu.memory_space<vmem>>) attributes {dimension_semantics = [#tpu.dimension_semantics<parallel>], iteration_bounds = array<i64: 8>, scalar_prefetch = 0 : i64, scratch_operands = 0 : i64, tpu.core_type = #tpu.core_type<tc>, window_params = [{transform_indices = @transform_0, window_bounds = array<i64: 3, 16, 16>}, {transform_indices = @transform_1, window_bounds = array<i64: 3, 8, 8>}]} {
    %0 = tpu.iota {dimensions = array<i32: 1>} : vector<8x16xi32>
    %1 = tpu.iota {dimensions = array<i32: 0>} : vector<8x16xi32>
    %c2_i32 = arith.constant 2 : i32
    %2 = vector.broadcast %c2_i32 : i32 to vector<8x16xi32>
    %3 = arith.muli %1, %2 : vector<8x16xi32>
    %c1_i32 = arith.constant 1 : i32
    %4 = vector.broadcast %c1_i32 : i32 to vector<8x16xi32>
    %5 = arith.subi %3, %4 : vector<8x16xi32>
    %6 = arith.cmpi sge, %0, %5 : vector<8x16xi32>
    %c3_i32 = arith.constant 3 : i32
    %7 = vector.broadcast %c3_i32 : i32 to vector<8x16xi32>
    %8 = arith.addi %5, %7 : vector<8x16xi32>
    %9 = arith.cmpi slt, %0, %8 : vector<8x16xi32>
    %10 = arith.andi %6, %9 : vector<8x16xi1>
    %c0 = arith.constant 0 : index
    %c0_0 = arith.constant 0 : index
    %c0_1 = arith.constant 0 : index
    %11 = vector.load %arg1[%c0, %c0_0, %c0_1] : memref<3x16x16xf32, #tpu.memory_space<vmem>>, vector<3x2x16xf32>
    %12 = vector.extract_strided_slice %11 {offsets = [0, 0, 0], sizes = [3, 1, 16], strides = [1, 1, 1]} : vector<3x2x16xf32> to vector<3x1x16xf32>
    %13 = vector.shape_cast %12 : vector<3x1x16xf32> to vector<3x16xf32>
    %14 = vector.extract_strided_slice %11 {offsets = [0, 1, 0], sizes = [3, 1, 16], strides = [1, 1, 1]} : vector<3x2x16xf32> to vector<3x1x16xf32>
    %15 = vector.shape_cast %14 : vector<3x1x16xf32> to vector<3x16xf32>
    %16 = arith.maximumf %13, %15 : vector<3x16xf32>
    %17 = vector.shape_cast %10 : vector<8x16xi1> to vector<1x8x16xi1>
    %18 = vector.shape_cast %16 : vector<3x16xf32> to vector<3x1x16xf32>
    %cst = arith.constant 0xFF800000 : f32
    %19 = vector.shape_cast %17 : vector<1x8x16xi1> to vector<1x8x16xi1>
    %20 = vector.broadcast %19 : vector<1x8x16xi1> to vector<3x8x16xi1>
    %21 = vector.shape_cast %18 : vector<3x1x16xf32> to vector<3x1x16xf32>
    %22 = vector.broadcast %21 : vector<3x1x16xf32> to vector<3x8x16xf32>
    %23 = vector.broadcast %cst : f32 to vector<3x8x16xf32>
    %24 = arith.select %20, %22, %23 : vector<3x8x16xi1>, vector<3x8x16xf32>
    %cst_2 = arith.constant dense<0xFF800000> : vector<3x8xf32>
    %25 = vector.multi_reduction <maximumf>, %24, %cst_2 [2] : vector<3x8x16xf32> to vector<3x8xf32>
    %26 = vector.shape_cast %25 : vector<3x8xf32> to vector<3x1x8xf32>
    %c0_3 = arith.constant 0 : index
    %c0_4 = arith.constant 0 : index
    %c0_5 = arith.constant 0 : index
    %27 = vector.load %arg2[%c0_3, %c0_4, %c0_5] : memref<3x8x8xf32, #tpu.memory_space<vmem>>, vector<3x1x8xf32>
    tpu.vector_store %arg2[%c0_3, %c0_4, %c0_5], %26 {strides = array<i32>} : memref<3x8x8xf32, #tpu.memory_space<vmem>>, vector<3x1x8xf32>,
    %c0_6 = arith.constant 0 : index
    %c1 = arith.constant 1 : index
    %c0_7 = arith.constant 0 : index
    %28 = vector.load %arg1[%c0_6, %c1, %c0_7] : memref<3x16x16xf32, #tpu.memory_space<vmem>>, vector<3x3x16xf32>
    %29 = vector.extract_strided_slice %28 {offsets = [0, 0, 0], sizes = [3, 1, 16], strides = [1, 1, 1]} : vector<3x3x16xf32> to vector<3x1x16xf32>
    %30 = vector.shape_cast %29 : vector<3x1x16xf32> to vector<3x16xf32>
    %31 = vector.extract_strided_slice %28 {offsets = [0, 1, 0], sizes = [3, 1, 16], strides = [1, 1, 1]} : vector<3x3x16xf32> to vector<3x1x16xf32>
    %32 = vector.shape_cast %31 : vector<3x1x16xf32> to vector<3x16xf32>
    %33 = arith.maximumf %30, %32 : vector<3x16xf32>
    %34 = vector.extract_strided_slice %28 {offsets = [0, 2, 0], sizes = [3, 1, 16], strides = [1, 1, 1]} : vector<3x3x16xf32> to vector<3x1x16xf32>
    %35 = vector.shape_cast %34 : vector<3x1x16xf32> to vector<3x16xf32>
    %36 = arith.maximumf %33, %35 : vector<3x16xf32>
    %37 = vector.shape_cast %10 : vector<8x16xi1> to vector<1x8x16xi1>
    %38 = vector.shape_cast %36 : vector<3x16xf32> to vector<3x1x16xf32>
    %cst_8 = arith.constant 0xFF800000 : f32
    %39 = vector.shape_cast %37 : vector<1x8x16xi1> to vector<1x8x16xi1>
    %40 = vector.broadcast %39 : vector<1x8x16xi1> to vector<3x8x16xi1>
    %41 = vector.shape_cast %38 : vector<3x1x16xf32> to vector<3x1x16xf32>
    %42 = vector.broadcast %41 : vector<3x1x16xf32> to vector<3x8x16xf32>
    %43 = vector.broadcast %cst_8 : f32 to vector<3x8x16xf32>
    %44 = arith.select %40, %42, %43 : vector<3x8x16xi1>, vector<3x8x16xf32>
    %cst_9 = arith.constant dense<0xFF800000> : vector<3x8xf32>
    %45 = vector.multi_reduction <maximumf>, %44, %cst_9 [2] : vector<3x8x16xf32> to vector<3x8xf32>
    %46 = vector.shape_cast %45 : vector<3x8xf32> to vector<3x1x8xf32>
    %c0_10 = arith.constant 0 : index
    %c1_11 = arith.constant 1 : index
    %c0_12 = arith.constant 0 : index
    %47 = vector.load %arg2[%c0_10, %c1_11, %c0_12] : memref<3x8x8xf32, #tpu.memory_space<vmem>>, vector<3x1x8xf32>
    tpu.vector_store %arg2[%c0_10, %c1_11, %c0_12], %46 {strides = array<i32>} : memref<3x8x8xf32, #tpu.memory_space<vmem>>, vector<3x1x8xf32>,
    %c0_13 = arith.constant 0 : index
    %c3 = arith.constant 3 : index
    %c0_14 = arith.constant 0 : index
    %48 = vector.load %arg1[%c0_13, %c3, %c0_14] : memref<3x16x16xf32, #tpu.memory_space<vmem>>, vector<3x3x16xf32>
    %49 = vector.extract_strided_slice %48 {offsets = [0, 0, 0], sizes = [3, 1, 16], strides = [1, 1, 1]} : vector<3x3x16xf32> to vector<3x1x16xf32>
    %50 = vector.shape_cast %49 : vector<3x1x16xf32> to vector<3x16xf32>
    %51 = vector.extract_strided_slice %48 {offsets = [0, 1, 0], sizes = [3, 1, 16], strides = [1, 1, 1]} : vector<3x3x16xf32> to vector<3x1x16xf32>
    %52 = vector.shape_cast %51 : vector<3x1x16xf32> to vector<3x16xf32>
    %53 = arith.maximumf %50, %52 : vector<3x16xf32>
    %54 = vector.extract_strided_slice %48 {offsets = [0, 2, 0], sizes = [3, 1, 16], strides = [1, 1, 1]} : vector<3x3x16xf32> to vector<3x1x16xf32>
    %55 = vector.shape_cast %54 : vector<3x1x16xf32> to vector<3x16xf32>
    %56 = arith.maximumf %53, %55 : vector<3x16xf32>
    %57 = vector.shape_cast %10 : vector<8x16xi1> to vector<1x8x16xi1>
    %58 = vector.shape_cast %56 : vector<3x16xf32> to vector<3x1x16xf32>
    %cst_15 = arith.constant 0xFF800000 : f32
    %59 = vector.shape_cast %57 : vector<1x8x16xi1> to vector<1x8x16xi1>
    %60 = vector.broadcast %59 : vector<1x8x16xi1> to vector<3x8x16xi1>
    %61 = vector.shape_cast %58 : vector<3x1x16xf32> to vector<3x1x16xf32>
    %62 = vector.broadcast %61 : vector<3x1x16xf32> to vector<3x8x16xf32>
    %63 = vector.broadcast %cst_15 : f32 to vector<3x8x16xf32>
    %64 = arith.select %60, %62, %63 : vector<3x8x16xi1>, vector<3x8x16xf32>
    %cst_16 = arith.constant dense<0xFF800000> : vector<3x8xf32>
    %65 = vector.multi_reduction <maximumf>, %64, %cst_16 [2] : vector<3x8x16xf32> to vector<3x8xf32>
    %66 = vector.shape_cast %65 : vector<3x8xf32> to vector<3x1x8xf32>
    %c0_17 = arith.constant 0 : index
    %c2 = arith.constant 2 : index
    %c0_18 = arith.constant 0 : index
    %67 = vector.load %arg2[%c0_17, %c2, %c0_18] : memref<3x8x8xf32, #tpu.memory_space<vmem>>, vector<3x1x8xf32>
    tpu.vector_store %arg2[%c0_17, %c2, %c0_18], %66 {strides = array<i32>} : memref<3x8x8xf32, #tpu.memory_space<vmem>>, vector<3x1x8xf32>,
    %c0_19 = arith.constant 0 : index
    %c5 = arith.constant 5 : index
    %c0_20 = arith.constant 0 : index
    %68 = vector.load %arg1[%c0_19, %c5, %c0_20] : memref<3x16x16xf32, #tpu.memory_space<vmem>>, vector<3x3x16xf32>
    %69 = vector.extract_strided_slice %68 {offsets = [0, 0, 0], sizes = [3, 1, 16], strides = [1, 1, 1]} : vector<3x3x16xf32> to vector<3x1x16xf32>
    %70 = vector.shape_cast %69 : vector<3x1x16xf32> to vector<3x16xf32>
    %71 = vector.extract_strided_slice %68 {offsets = [0, 1, 0], sizes = [3, 1, 16], strides = [1, 1, 1]} : vector<3x3x16xf32> to vector<3x1x16xf32>
    %72 = vector.shape_cast %71 : vector<3x1x16xf32> to vector<3x16xf32>
    %73 = arith.maximumf %70, %72 : vector<3x16xf32>
    %74 = vector.extract_strided_slice %68 {offsets = [0, 2, 0], sizes = [3, 1, 16], strides = [1, 1, 1]} : vector<3x3x16xf32> to vector<3x1x16xf32>
    %75 = vector.shape_cast %74 : vector<3x1x16xf32> to vector<3x16xf32>
    %76 = arith.maximumf %73, %75 : vector<3x16xf32>
    %77 = vector.shape_cast %10 : vector<8x16xi1> to vector<1x8x16xi1>
    %78 = vector.shape_cast %76 : vector<3x16xf32> to vector<3x1x16xf32>
    %cst_21 = arith.constant 0xFF800000 : f32
    %79 = vector.shape_cast %77 : vector<1x8x16xi1> to vector<1x8x16xi1>
    %80 = vector.broadcast %79 : vector<1x8x16xi1> to vector<3x8x16xi1>
    %81 = vector.shape_cast %78 : vector<3x1x16xf32> to vector<3x1x16xf32>
    %82 = vector.broadcast %81 : vector<3x1x16xf32> to vector<3x8x16xf32>
    %83 = vector.broadcast %cst_21 : f32 to vector<3x8x16xf32>
    %84 = arith.select %80, %82, %83 : vector<3x8x16xi1>, vector<3x8x16xf32>
    %cst_22 = arith.constant dense<0xFF800000> : vector<3x8xf32>
    %85 = vector.multi_reduction <maximumf>, %84, %cst_22 [2] : vector<3x8x16xf32> to vector<3x8xf32>
    %86 = vector.shape_cast %85 : vector<3x8xf32> to vector<3x1x8xf32>
    %c0_23 = arith.constant 0 : index
    %c3_24 = arith.constant 3 : index
    %c0_25 = arith.constant 0 : index
    %87 = vector.load %arg2[%c0_23, %c3_24, %c0_25] : memref<3x8x8xf32, #tpu.memory_space<vmem>>, vector<3x1x8xf32>
    tpu.vector_store %arg2[%c0_23, %c3_24, %c0_25], %86 {strides = array<i32>} : memref<3x8x8xf32, #tpu.memory_space<vmem>>, vector<3x1x8xf32>,
    %c0_26 = arith.constant 0 : index
    %c7 = arith.constant 7 : index
    %c0_27 = arith.constant 0 : index
    %88 = vector.load %arg1[%c0_26, %c7, %c0_27] : memref<3x16x16xf32, #tpu.memory_space<vmem>>, vector<3x3x16xf32>
    %89 = vector.extract_strided_slice %88 {offsets = [0, 0, 0], sizes = [3, 1, 16], strides = [1, 1, 1]} : vector<3x3x16xf32> to vector<3x1x16xf32>
    %90 = vector.shape_cast %89 : vector<3x1x16xf32> to vector<3x16xf32>
    %91 = vector.extract_strided_slice %88 {offsets = [0, 1, 0], sizes = [3, 1, 16], strides = [1, 1, 1]} : vector<3x3x16xf32> to vector<3x1x16xf32>
    %92 = vector.shape_cast %91 : vector<3x1x16xf32> to vector<3x16xf32>
    %93 = arith.maximumf %90, %92 : vector<3x16xf32>
    %94 = vector.extract_strided_slice %88 {offsets = [0, 2, 0], sizes = [3, 1, 16], strides = [1, 1, 1]} : vector<3x3x16xf32> to vector<3x1x16xf32>
    %95 = vector.shape_cast %94 : vector<3x1x16xf32> to vector<3x16xf32>
    %96 = arith.maximumf %93, %95 : vector<3x16xf32>
    %97 = vector.shape_cast %10 : vector<8x16xi1> to vector<1x8x16xi1>
    %98 = vector.shape_cast %96 : vector<3x16xf32> to vector<3x1x16xf32>
    %cst_28 = arith.constant 0xFF800000 : f32
    %99 = vector.shape_cast %97 : vector<1x8x16xi1> to vector<1x8x16xi1>
    %100 = vector.broadcast %99 : vector<1x8x16xi1> to vector<3x8x16xi1>
    %101 = vector.shape_cast %98 : vector<3x1x16xf32> to vector<3x1x16xf32>
    %102 = vector.broadcast %101 : vector<3x1x16xf32> to vector<3x8x16xf32>
    %103 = vector.broadcast %cst_28 : f32 to vector<3x8x16xf32>
    %104 = arith.select %100, %102, %103 : vector<3x8x16xi1>, vector<3x8x16xf32>
    %cst_29 = arith.constant dense<0xFF800000> : vector<3x8xf32>
    %105 = vector.multi_reduction <maximumf>, %104, %cst_29 [2] : vector<3x8x16xf32> to vector<3x8xf32>
    %106 = vector.shape_cast %105 : vector<3x8xf32> to vector<3x1x8xf32>
    %c0_30 = arith.constant 0 : index
    %c4 = arith.constant 4 : index
    %c0_31 = arith.constant 0 : index
    %107 = vector.load %arg2[%c0_30, %c4, %c0_31] : memref<3x8x8xf32, #tpu.memory_space<vmem>>, vector<3x1x8xf32>
    tpu.vector_store %arg2[%c0_30, %c4, %c0_31], %106 {strides = array<i32>} : memref<3x8x8xf32, #tpu.memory_space<vmem>>, vector<3x1x8xf32>,
    %c0_32 = arith.constant 0 : index
    %c9 = arith.constant 9 : index
    %c0_33 = arith.constant 0 : index
    %108 = vector.load %arg1[%c0_32, %c9, %c0_33] : memref<3x16x16xf32, #tpu.memory_space<vmem>>, vector<3x3x16xf32>
    %109 = vector.extract_strided_slice %108 {offsets = [0, 0, 0], sizes = [3, 1, 16], strides = [1, 1, 1]} : vector<3x3x16xf32> to vector<3x1x16xf32>
    %110 = vector.shape_cast %109 : vector<3x1x16xf32> to vector<3x16xf32>
    %111 = vector.extract_strided_slice %108 {offsets = [0, 1, 0], sizes = [3, 1, 16], strides = [1, 1, 1]} : vector<3x3x16xf32> to vector<3x1x16xf32>
    %112 = vector.shape_cast %111 : vector<3x1x16xf32> to vector<3x16xf32>
    %113 = arith.maximumf %110, %112 : vector<3x16xf32>
    %114 = vector.extract_strided_slice %108 {offsets = [0, 2, 0], sizes = [3, 1, 16], strides = [1, 1, 1]} : vector<3x3x16xf32> to vector<3x1x16xf32>
    %115 = vector.shape_cast %114 : vector<3x1x16xf32> to vector<3x16xf32>
    %116 = arith.maximumf %113, %115 : vector<3x16xf32>
    %117 = vector.shape_cast %10 : vector<8x16xi1> to vector<1x8x16xi1>
    %118 = vector.shape_cast %116 : vector<3x16xf32> to vector<3x1x16xf32>
    %cst_34 = arith.constant 0xFF800000 : f32
    %119 = vector.shape_cast %117 : vector<1x8x16xi1> to vector<1x8x16xi1>
    %120 = vector.broadcast %119 : vector<1x8x16xi1> to vector<3x8x16xi1>
    %121 = vector.shape_cast %118 : vector<3x1x16xf32> to vector<3x1x16xf32>
    %122 = vector.broadcast %121 : vector<3x1x16xf32> to vector<3x8x16xf32>
    %123 = vector.broadcast %cst_34 : f32 to vector<3x8x16xf32>
    %124 = arith.select %120, %122, %123 : vector<3x8x16xi1>, vector<3x8x16xf32>
    %cst_35 = arith.constant dense<0xFF800000> : vector<3x8xf32>
    %125 = vector.multi_reduction <maximumf>, %124, %cst_35 [2] : vector<3x8x16xf32> to vector<3x8xf32>
    %126 = vector.shape_cast %125 : vector<3x8xf32> to vector<3x1x8xf32>
    %c0_36 = arith.constant 0 : index
    %c5_37 = arith.constant 5 : index
    %c0_38 = arith.constant 0 : index
    %127 = vector.load %arg2[%c0_36, %c5_37, %c0_38] : memref<3x8x8xf32, #tpu.memory_space<vmem>>, vector<3x1x8xf32>
    tpu.vector_store %arg2[%c0_36, %c5_37, %c0_38], %126 {strides = array<i32>} : memref<3x8x8xf32, #tpu.memory_space<vmem>>, vector<3x1x8xf32>,
    %c0_39 = arith.constant 0 : index
    %c11 = arith.constant 11 : index
    %c0_40 = arith.constant 0 : index
    %128 = vector.load %arg1[%c0_39, %c11, %c0_40] : memref<3x16x16xf32, #tpu.memory_space<vmem>>, vector<3x3x16xf32>
    %129 = vector.extract_strided_slice %128 {offsets = [0, 0, 0], sizes = [3, 1, 16], strides = [1, 1, 1]} : vector<3x3x16xf32> to vector<3x1x16xf32>
    %130 = vector.shape_cast %129 : vector<3x1x16xf32> to vector<3x16xf32>
    %131 = vector.extract_strided_slice %128 {offsets = [0, 1, 0], sizes = [3, 1, 16], strides = [1, 1, 1]} : vector<3x3x16xf32> to vector<3x1x16xf32>
    %132 = vector.shape_cast %131 : vector<3x1x16xf32> to vector<3x16xf32>
    %133 = arith.maximumf %130, %132 : vector<3x16xf32>
    %134 = vector.extract_strided_slice %128 {offsets = [0, 2, 0], sizes = [3, 1, 16], strides = [1, 1, 1]} : vector<3x3x16xf32> to vector<3x1x16xf32>
    %135 = vector.shape_cast %134 : vector<3x1x16xf32> to vector<3x16xf32>
    %136 = arith.maximumf %133, %135 : vector<3x16xf32>
    %137 = vector.shape_cast %10 : vector<8x16xi1> to vector<1x8x16xi1>
    %138 = vector.shape_cast %136 : vector<3x16xf32> to vector<3x1x16xf32>
    %cst_41 = arith.constant 0xFF800000 : f32
    %139 = vector.shape_cast %137 : vector<1x8x16xi1> to vector<1x8x16xi1>
    %140 = vector.broadcast %139 : vector<1x8x16xi1> to vector<3x8x16xi1>
    %141 = vector.shape_cast %138 : vector<3x1x16xf32> to vector<3x1x16xf32>
    %142 = vector.broadcast %141 : vector<3x1x16xf32> to vector<3x8x16xf32>
    %143 = vector.broadcast %cst_41 : f32 to vector<3x8x16xf32>
    %144 = arith.select %140, %142, %143 : vector<3x8x16xi1>, vector<3x8x16xf32>
    %cst_42 = arith.constant dense<0xFF800000> : vector<3x8xf32>
    %145 = vector.multi_reduction <maximumf>, %144, %cst_42 [2] : vector<3x8x16xf32> to vector<3x8xf32>
    %146 = vector.shape_cast %145 : vector<3x8xf32> to vector<3x1x8xf32>
    %c0_43 = arith.constant 0 : index
    %c6 = arith.constant 6 : index
    %c0_44 = arith.constant 0 : index
    %147 = vector.load %arg2[%c0_43, %c6, %c0_44] : memref<3x8x8xf32, #tpu.memory_space<vmem>>, vector<3x1x8xf32>
    tpu.vector_store %arg2[%c0_43, %c6, %c0_44], %146 {strides = array<i32>} : memref<3x8x8xf32, #tpu.memory_space<vmem>>, vector<3x1x8xf32>,
    %c0_45 = arith.constant 0 : index
    %c13 = arith.constant 13 : index
    %c0_46 = arith.constant 0 : index
    %148 = vector.load %arg1[%c0_45, %c13, %c0_46] : memref<3x16x16xf32, #tpu.memory_space<vmem>>, vector<3x3x16xf32>
    %149 = vector.extract_strided_slice %148 {offsets = [0, 0, 0], sizes = [3, 1, 16], strides = [1, 1, 1]} : vector<3x3x16xf32> to vector<3x1x16xf32>
    %150 = vector.shape_cast %149 : vector<3x1x16xf32> to vector<3x16xf32>
    %151 = vector.extract_strided_slice %148 {offsets = [0, 1, 0], sizes = [3, 1, 16], strides = [1, 1, 1]} : vector<3x3x16xf32> to vector<3x1x16xf32>
    %152 = vector.shape_cast %151 : vector<3x1x16xf32> to vector<3x16xf32>
    %153 = arith.maximumf %150, %152 : vector<3x16xf32>
    %154 = vector.extract_strided_slice %148 {offsets = [0, 2, 0], sizes = [3, 1, 16], strides = [1, 1, 1]} : vector<3x3x16xf32> to vector<3x1x16xf32>
    %155 = vector.shape_cast %154 : vector<3x1x16xf32> to vector<3x16xf32>
    %156 = arith.maximumf %153, %155 : vector<3x16xf32>
    %157 = vector.shape_cast %10 : vector<8x16xi1> to vector<1x8x16xi1>
    %158 = vector.shape_cast %156 : vector<3x16xf32> to vector<3x1x16xf32>
    %cst_47 = arith.constant 0xFF800000 : f32
    %159 = vector.shape_cast %157 : vector<1x8x16xi1> to vector<1x8x16xi1>
    %160 = vector.broadcast %159 : vector<1x8x16xi1> to vector<3x8x16xi1>
    %161 = vector.shape_cast %158 : vector<3x1x16xf32> to vector<3x1x16xf32>
    %162 = vector.broadcast %161 : vector<3x1x16xf32> to vector<3x8x16xf32>
    %163 = vector.broadcast %cst_47 : f32 to vector<3x8x16xf32>
    %164 = arith.select %160, %162, %163 : vector<3x8x16xi1>, vector<3x8x16xf32>
    %cst_48 = arith.constant dense<0xFF800000> : vector<3x8xf32>
    %165 = vector.multi_reduction <maximumf>, %164, %cst_48 [2] : vector<3x8x16xf32> to vector<3x8xf32>
    %166 = vector.shape_cast %165 : vector<3x8xf32> to vector<3x1x8xf32>
    %c0_49 = arith.constant 0 : index
    %c7_50 = arith.constant 7 : index
    %c0_51 = arith.constant 0 : index
    %167 = vector.load %arg2[%c0_49, %c7_50, %c0_51] : memref<3x8x8xf32, #tpu.memory_space<vmem>>, vector<3x1x8xf32>
    tpu.vector_store %arg2[%c0_49, %c7_50, %c0_51], %166 {strides = array<i32>} : memref<3x8x8xf32, #tpu.memory_space<vmem>>, vector<3x1x8xf32>,
    return
  }
  func.func @transform_0(%arg0: i32) -> (i32, i32, i32) {
    %c0_i32 = arith.constant 0 : i32
    %c0_i32_0 = arith.constant 0 : i32
    %c0_i32_1 = arith.constant 0 : i32
    return %arg0, %c0_i32, %c0_i32_0 : i32, i32, i32
  }
  func.func @transform_1(%arg0: i32) -> (i32, i32, i32) {
    %c0_i32 = arith.constant 0 : i32
    %c0_i32_0 = arith.constant 0 : i32
    %c0_i32_1 = arith.constant 0 : i32
    return %arg0, %c0_i32, %c0_i32_0 : i32, i32, i32
  }
}

</mosaic_0001>

<bundles_post_ra>
// kernel: group_spatial_max_pool.1
= control target key start
LH: loop header
LB: loop body
LE: loop exit
PB: predicated region body
PF: predicated region fallthrough
CT: control target
= control target key end

     0   :  { %6 = vsyncpa [#allocation3], 0  ;;  %s1324_s0 = inlined_call_operand.hbm [shape: f32[24,16,16], index: 0, kind: input, shape index: {}]   ;;  %s1325_s1 = inlined_call_operand.hbm [shape: f32[24,8,8], index: 1, kind: output, shape index: {}]  }
   0x1   :  { %8 = vsyncpa [#allocation3 + $0x1], 0 }
   0x2   :  { %9 = vsyncpa [#allocation4], 0 }
   0x3   :  { %11 = vsyncpa [#allocation4 + $0x1], 0  ;;  %s963_s6 = smov 0   ;;  %s965_s7 = smov 0  }
   0x4   :  { %s967_s8 = smov 0   ;;  %s969_s9 = smov 0  }
   0x5 LB: > { %s984_s10 = sadd.s32 4294967295, %s945_s9   ;;  %s782_s11 = sadd.s32 4294967294, %s945_s9   ;;  %s945_s9 = sphi %s969_s9, %s1338_s9   ;;  %s941_s8 = sphi %s967_s8, %s1337_s8   ;;  %s937_s7 = sphi %s965_s7, %s1336_s7   ;;  %s933_s6 = sphi %s963_s6, %s1335_s6  }
   0x6   : > { %s988_s12 = sadd.s32 1, %s945_s9   ;;  %s24_s13 = sadd.s32 1, %s941_s8 }
   0x7   : > { %s21_s14 = ssub.s32 %s945_s9, %s988_s12  ;;  %p31_p0 = scmp.ne.s32.totalorder %s941_s8, %s937_s7 }
   0x8   : > { %p22_p1 = scmp.eq.s32.totalorder %s21_s14, 0  ;;  %p32_p2 = scmp.eq.s32.totalorder %s945_s9, 0 }
   0x9   : > { %p37_p3 = scmp.ne.s32.totalorder %s937_s7, %s933_s6  ;;  %p38_p4 = scmp.eq.s32.totalorder %s984_s10, 0 }
   0xa   : > { %s1000_s15 = scalar_select %p22_p1, %s941_s8, %s24_s13  }
   0xb   : > { %p33_p5 = por %p32_p2, %p31_p0  ;;  %p1002_p6 = por %p38_p4, %p37_p3 }
   0xc   : > { %p61_p7 = scmp.eq.s32.totalorder %s984_s10, 7  ;;  %p67_p8 = scmp.eq.s32.totalorder %s782_s11, 7 }
   0xd   : > { %p811_p9 = scmp.lt.s32.totalorder %s945_s9, 8  ;;  %s87_s19 = sand.u32 1, %s941_s8  }
   0xe   : > { %p1008_p10 = por %p61_p7, %p31_p0  ;;  %p1012_p11 = por %p67_p8, %p37_p3 }
   0xf   : > { %s795_s20 = smul.u32 768, %s945_s9  ;;  %p1023_p12 = pnand %p811_p9, %p33_p5 }
  0x10   : > { %s1328_s17 = scalar_select %p1008_p10, 1, 0 }
  0x11   : > { %s1329_s18 = scalar_select %p1012_p11, 1, 0 }
  0x12   : > { %s796_s21 = smul.u32 48, %s87_s19  ;;  %s1021_s24 = scalar_lea.hbm %s1324_s0, %s795_s20 }
  0x13   : > { %s1029_s28 = scalar_lea.sflag [#allocation3], %s87_s19  ;;  %s849_s29 = scalar_lea.hbm %s1021_s24, 768 }
  0x14   : > { %s91_s26 = scalar_lea.vmem [#allocation2], %s796_s21  ;;  %p850_p13 = scmp.ne.s32.totalorder %s1021_s24, %s849_s29 }
  0x15   : > { %s99_s27 = sshll.u32 %s91_s26, 4  ;;  %p851_p0 = pneg %p1023_p12  ;;  %s1027_s27 = int_to_ptr.vmem [resolvable:$true] %s99_s27 }
  0x16   : > { %s854_s3 = scalar_lea.hbm %s1324_s0, 6144  ;;  %p855_p3 = scmp.lt.u32.totalorder %s1021_s24, %s1324_s0 }
  0x17   : > { %p852_p1 = pnand %p851_p0, %p850_p13  ;;  %p856_p4 = scmp.lt.u32.totalorder %s854_s3, %s849_s29 }
  0x18   : > { %p858_p7 = scmp.lt.u32.totalorder %s849_s29, %s1021_s24 }
  0x19   : > { %p853_p2 = pneg %p852_p1  ;;  %p857_p5 = por %p856_p4, %p855_p3 }
  0x1b   : > { %p859_p8 = por %p858_p7, %p857_p5 }
  0x1d   : > { %p860_p9 = pnand %p859_p8, %p853_p2 }
  0x1f   : > { %863 = shalt.err (!%p860_p9)
}
  0x20   : > { %s864_s11 = scalar_lea.vmem %s1027_s27, 768  ;;  %s947_s13 = smov [#allocation2]  }
  0x21   : > { %p865_p13 = scmp.ne.s32.totalorder %s1027_s27, %s864_s11  ;;  %s869_s14 = sshll.u32 %s947_s13, 4  ;;  %s870_s14 = int_to_ptr.vmem [resolvable:$false] %s869_s14 }
  0x22   : > { %s871_s19 = scalar_lea.vmem %s870_s14, 1536  ;;  %p872_p10 = scmp.lt.s32.totalorder %s1027_s27, %s870_s14 }
  0x23   : > { %p867_p1 = pnand %p865_p13, %p851_p0  ;;  %p873_p3 = scmp.lt.s32.totalorder %s871_s19, %s864_s11 }
  0x25   : > { %p868_p11 = pneg %p867_p1  ;;  %p874_p4 = por %p873_p3, %p872_p10 }
  0x27   : > { %p875_p5 = pnand %p874_p4, %p868_p11 }
  0x29   : > { %878 = shalt.err (!%p875_p5)
}
  0x2a   : > { %s948_s20 = smov 128   ;;  %s949_s21 = smov 8  }
  0x2b   : > { %806 = dma.hbm_to_vmem [thread:$0]  (!%p1023_p12), %s1021_s24, 768, %s1027_s27, %s1029_s28, %s948_s20, %s948_s20, %s949_s21  }
  0x2c   : > { %p787_p0 = scmp.ge.s32.totalorder %s945_s9, 1  ;;  %p107_p2 = scmp.lt.s32.totalorder %s945_s9, 9 }
  0x2e   : > { %p108_p7 = pnand %p787_p0, %p107_p2 }
  0x2f   : > { %s1060_s22 = sand.u32 (!%p108_p7), 1, %s937_s7  }
  0x30   : > { %111 = sbr.rel (%p108_p7) target bundleno = 273 (0x111), region = 24  ;;  %s114_s26 = scalar_lea.sflag (!%p108_p7), [#allocation3], %s1060_s22 }
  0x31   : > { %s797_s23 = smul.u32 (!%p108_p7), 48, %s1060_s22 }
  0x33   : > { %s1064_s29 = scalar_lea.vmem (!%p108_p7), [#allocation2], %s797_s23 }
  0x37   : > { %924 = dma.done.wait (%p1002_p6), %s114_s26, 768  }
  0x38   : > { %926 = vsyncadd (%p1002_p6), %s114_s26, 4294966528  ;;  %v138_v0 = vlaneseq  ;;  %v150_v7 = vld [vmem:[%s1064_s29 + $0x20] sm:$0x3]  ;;  %v149_v13 = vld [vmem:[%s1064_s29 + $0x10] sm:$0x3]  ;;  %vm180_vm1 = vcmask 130048  }
  0x39   : > { %v148_v8 = vld [vmem:[%s1064_s29] sm:$0x3]  ;;  %v156_v11 = vrot.slane %v150_v7, 1  ;;  %v155_v16 = vrot.slane %v149_v13, 1  ;;  %v213_v21 = vld [vmem:[%s1064_s29 + $0x11] sm:$0x7] }
  0x3a   : > { %v139_v1 = vand.u32 127, %v138_v0  ;;  %v141_v2 = vshrl.u32 %v138_v0, 7  ;;  %v212_v9 = vld [vmem:[%s1064_s29 + $0x1] sm:$0x7]  ;;  %v154_v12 = vrot.slane %v148_v8, 1  ;;  %v219_v27 = vrot.slane %v213_v21, 1 }
  0x3b   : > { %v218_v14 = vrot.slane %v212_v9, 1  ;;  %v227_v15 = vrot.slane %v212_v9, 2  ;;  %v214_v17 = vld [vmem:[%s1064_s29 + $0x21] sm:$0x7]  ;;  %v162_v18 = vmax.f32 %v150_v7, %v156_v11  ;;  %v282_v22 = vld [vmem:[%s1064_s29 + $0x13] sm:$0x7]  ;;  %v161_v25 = vmax.f32 %v149_v13, %v155_v16 }
  0x3c   : > { %v142_v3 = vmul.u32 2, %v141_v2  ;;  %v1070_v4 = vsub.s32 %v139_v1, %v141_v2  ;;  %v1072_v6 = vsub.s32 0, %v141_v2  ;;  %v160_v19 = vmax.f32 %v148_v8, %v154_v12  ;;  %v281_v36 = vld [vmem:[%s1064_s29 + $0x3] sm:$0x7]  ;;  %v351_v0 = vld [vmem:[%s1064_s29 + $0x15] sm:$0x7] }
  0x3d   : > { %v220_v20 = vrot.slane %v214_v17, 1  ;;  %v224_v24 = vmax.f32 %v212_v9, %v218_v14  ;;  %v229_v26 = vrot.slane %v214_v17, 2  ;;  %v228_v31 = vrot.slane %v213_v21, 2  ;;  %v350_v41 = vld [vmem:[%s1064_s29 + $0x5] sm:$0x7]  ;;  %s798_s16 = smul.u32 24, %s1060_s22 }
  0x3e   : > { %v788_v5 = vadd.s32 4294967295, %v142_v3  ;;  %v176_v28 = vrot.slane %v162_v18, %v1072_v6  ;;  %v168_v29 = vrot.slane %v160_v19, %v1072_v6  ;;  %v172_v33 = vrot.slane %v161_v25, %v1072_v6  ;;  %v283_v54 = vld [vmem:[%s1064_s29 + $0x23] sm:$0x7]  ;;  %v420_v11 = vld [vmem:[%s1064_s29 + $0x17] sm:$0x7]  ;;  %s794_s25 = smul.u32 384, %s984_s10 }
  0x3f   : > { %v226_v30 = vmax.f32 %v214_v17, %v220_v20  ;;  %v233_v32 = vmax.f32 %v224_v24, %v227_v15  ;;  %v225_v34 = vmax.f32 %v213_v21, %v219_v27  ;;  %v288_v35 = vrot.slane %v282_v22, 1  ;;  %v352_v59 = vld [vmem:[%s1064_s29 + $0x25] sm:$0x7]  ;;  %s1202_s24 = scalar_lea.vmem [#allocation5], %s798_s16  ;;  %s696_s10 = scalar_lea.sflag [#allocation4], %s1060_s22 }
  0x40   : > { %vm144_vm0 = vcmp.ge.s32.totalorder %v139_v1, %v788_v5  ;;  %v145_v10 = vadd.s32 3, %v788_v5  ;;  %v297_v40 = vrot.slane %v282_v22, 2  ;;  %v287_v51 = vrot.slane %v281_v36, 1  ;;  %v419_v25 = vld [vmem:[%s1064_s29 + $0x7] sm:$0x7]  ;;  %s709_s27 = sshll.u32 %s1202_s24, 4  ;;  %s1273_s2 = scalar_lea.hbm %s1325_s1, %s794_s25  ;;  %s1275_s27 = int_to_ptr.vmem [resolvable:$true] %s709_s27 }
  0x41   : > { %v235_v39 = vmax.f32 %v226_v30, %v229_v26  ;;  %v239_v44 = vrot.slane %v233_v32, %v1072_v6  ;;  %v234_v48 = vmax.f32 %v225_v34, %v228_v31  ;;  %v294_v49 = vmax.f32 %v282_v22, %v288_v35  ;;  %v488_v30 = vld [vmem:[%s1064_s29 + $0x9] sm:$0x7]  ;;  %s879_s3 = scalar_lea.vmem %s1275_s27, 384  ;;  %p1333_p10 = scmp.ne.s32.totalorder %s1328_s17, 0 }
  0x42   : > { %vm146_vm2 = vcmp.lt.s32.totalorder %v139_v1, %v145_v10  ;;  %v296_v52 = vrot.slane %v281_v36, 2  ;;  %v356_v53 = vrot.slane %v350_v41, 1  ;;  %v293_v61 = vmax.f32 %v281_v36, %v287_v51  ;;  %p880_p6 = scmp.ne.s32.totalorder %s1275_s27, %s879_s3  ;;  %s950_s4 = smov [#allocation5]  }
  0x43   : > { %vm1082_vm3 = vmand %vm144_vm0, %vm146_vm2  ;;  %v247_v47 = vrot.slane %v235_v39, %v1072_v6  ;;  %v243_v57 = vrot.slane %v234_v48, %v1072_v6  ;;  %v303_v58 = vmax.f32 %v294_v49, %v297_v40  ;;  %v365_v63 = vrot.slane %v350_v41, 2  ;;  %v421_v39 = vld [vmem:[%s1064_s29 + $0x27] sm:$0x7]  ;;  %s883_s5 = sshll.u32 %s950_s4, 4  ;;  %s884_s5 = int_to_ptr.vmem [resolvable:$false] %s883_s5 }
  0x44   : > { %v179_v37 = vsel %vm1082_vm3, %v176_v28, -inf  ;;  %v177_v38 = vsel %vm1082_vm3, %v168_v29, -inf  ;;  %v178_v45 = vsel %vm1082_vm3, %v172_v33, -inf  ;;  %v248_v50 = vsel %vm1082_vm3, %v239_v44, -inf  ;;  %v490_v48 = vld [vmem:[%s1064_s29 + $0x29] sm:$0x7]  ;;  %p881_p11 = pnand %p880_p6, %p1333_p10  ;;  %p886_p8 = scmp.lt.s32.totalorder %s1275_s27, %s884_s5 }
  0x45   : > { %v187_v42 = vsel %vm180_vm1, %v179_v37, -inf  ;;  %v181_v43 = vsel %vm180_vm1, %v177_v38, -inf  ;;  %v184_v46 = vsel %vm180_vm1, %v178_v45, -inf  ;;  %v251_v55 = vsel %vm180_vm1, %v248_v50, -inf  ;;  %s885_s11 = scalar_lea.vmem %s884_s5, 768 }
  0x46   : > { %188 = vmax.xlane.f32.xlu1 %v187_v42  ;;  %182 = vmax.xlane.f32.xlu0 %v181_v43  ;;  %v250_v56 = vsel %vm1082_vm3, %v247_v47, -inf  ;;  %v362_v62 = vmax.f32 %v350_v41, %v356_v53  ;;  %v249_v1 = vsel %vm1082_vm3, %v243_v57, -inf  ;;  %v312_v2 = vrot.slane %v303_v58, %v1072_v6  ;;  %v489_v53 = vld [vmem:[%s1064_s29 + $0x19] sm:$0x7]  ;;  %p882_p12 = pneg %p881_p11  ;;  %p887_p9 = scmp.lt.s32.totalorder %s885_s11, %s879_s3 }
  0x47   : > { %v257_v60 = vsel %vm180_vm1, %v250_v56, -inf  ;;  %v289_v3 = vrot.slane %v283_v54, 1  ;;  %v298_v5 = vrot.slane %v283_v54, 2  ;;  %v254_v7 = vsel %vm180_vm1, %v249_v1, -inf }
  0x48   : > { %v302_v8 = vmax.f32 %v293_v61, %v296_v52  ;;  %v371_v9 = vmax.f32 %v362_v62, %v365_v63  ;;  %v358_v10 = vrot.slane %v352_v59, 1  ;;  %v318_v12 = vsel %vm1082_vm3, %v312_v2, -inf  ;;  %v558_v62 = vld [vmem:[%s1064_s29 + $0x1b] sm:$0x7]  ;;  %p888_p13 = por %p887_p9, %p886_p8 }
  0x49   : > { %v295_v13 = vmax.f32 %v283_v54, %v289_v3  ;;  %v367_v14 = vrot.slane %v352_v59, 2  ;;  %v357_v15 = vrot.slane %v351_v0, 1  ;;  %v323_v16 = vsel %vm180_vm1, %v318_v12, -inf }
  0x4a   : > { %252 = vmax.xlane.f32.xlu1 %v251_v55  ;;  %185 = vmax.xlane.f32.xlu0 %v184_v46  ;;  %v308_v17 = vrot.slane %v302_v8, %v1072_v6  ;;  %v377_v18 = vrot.slane %v371_v9, %v1072_v6  ;;  %v364_v19 = vmax.f32 %v352_v59, %v358_v10  ;;  %v366_v22 = vrot.slane %v351_v0, 2  ;;  %v557_v8 = vld [vmem:[%s1064_s29 + $0xb] sm:$0x7]  ;;  %p889_p1 = pnand %p888_p13, %p882_p12 }
  0x4b   : > { %v304_v20 = vmax.f32 %v295_v13, %v298_v5  ;;  %v363_v21 = vmax.f32 %v351_v0, %v357_v15  ;;  %v426_v24 = vrot.slane %v420_v11, 1  ;;  %v435_v29 = vrot.slane %v420_v11, 2  ;;  %v626_v13 = vld [vmem:[%s1064_s29 + $0xd] sm:$0x7] }
  0x4c   : > { %v317_v26 = vsel %vm1082_vm3, %v308_v17, -inf  ;;  %v386_v27 = vsel %vm1082_vm3, %v377_v18, -inf  ;;  %v373_v28 = vmax.f32 %v364_v19, %v367_v14  ;;  %v425_v37 = vrot.slane %v419_v25, 1 }
  0x4d   : > { %v320_v31 = vsel %vm180_vm1, %v317_v26, -inf  ;;  %v389_v32 = vsel %vm180_vm1, %v386_v27, -inf  ;;  %v316_v33 = vrot.slane %v304_v20, %v1072_v6  ;;  %v372_v34 = vmax.f32 %v363_v21, %v366_v22  ;;  %v559_v22 = vld [vmem:[%s1064_s29 + $0x2b] sm:$0x7] }
  0x4e   : > { %258 = vmax.xlane.f32.xlu1 %v257_v60  ;;  %255 = vmax.xlane.f32.xlu0 %v254_v7  ;;  %v385_v35 = vrot.slane %v373_v28, %v1072_v6  ;;  %v432_v36 = vmax.f32 %v420_v11, %v426_v24  ;;  %v434_v38 = vrot.slane %v419_v25, 2  ;;  %v494_v42 = vrot.slane %v488_v30, 1 }
  0x4f   : > { %v319_v40 = vsel %vm1082_vm3, %v316_v33, -inf  ;;  %v381_v41 = vrot.slane %v372_v34, %v1072_v6  ;;  %v503_v43 = vrot.slane %v488_v30, 2  ;;  %v431_v47 = vmax.f32 %v419_v25, %v425_v37 }
  0x50   : > { %v326_v44 = vsel %vm180_vm1, %v319_v40, -inf  ;;  %v388_v45 = vsel %vm1082_vm3, %v385_v35, -inf  ;;  %v441_v46 = vmax.f32 %v432_v36, %v435_v29  ;;  %v500_v51 = vmax.f32 %v488_v30, %v494_v42  ;;  %v628_v35 = vld [vmem:[%s1064_s29 + $0x2d] sm:$0x7]  ;;  %v627_v40 = vld [vmem:[%s1064_s29 + $0x1d] sm:$0x7] }
  0x51   : > { %v395_v49 = vsel %vm180_vm1, %v388_v45, -inf  ;;  %v387_v50 = vsel %vm1082_vm3, %v381_v41, -inf  ;;  %v427_v52 = vrot.slane %v421_v39, 1  ;;  %v440_v56 = vmax.f32 %v431_v47, %v434_v38 }
  0x52   : > { %324 = vmax.xlane.f32.xlu1 %v323_v16  ;;  %321 = vmax.xlane.f32.xlu0 %v320_v31  ;;  %v392_v54 = vsel %vm180_vm1, %v387_v50, -inf  ;;  %v450_v55 = vrot.slane %v441_v46, %v1072_v6  ;;  %v436_v57 = vrot.slane %v421_v39, 2  ;;  %v509_v58 = vmax.f32 %v500_v51, %v503_v43 }
  0x53   : > { %v433_v59 = vmax.f32 %v421_v39, %v427_v52  ;;  %v496_v60 = vrot.slane %v490_v48, 1  ;;  %v505_v61 = vrot.slane %v490_v48, 2  ;;  %v446_v0 = vrot.slane %v440_v56, %v1072_v6 }
  0x54   : > { %v456_v63 = vsel %vm1082_vm3, %v450_v55, -inf  ;;  %v495_v1 = vrot.slane %v489_v53, 1  ;;  %v504_v2 = vrot.slane %v489_v53, 2  ;;  %v515_v3 = vrot.slane %v509_v58, %v1072_v6 }
  0x55   : > { %v442_v5 = vmax.f32 %v433_v59, %v436_v57  ;;  %v502_v7 = vmax.f32 %v490_v48, %v496_v60  ;;  %v455_v9 = vsel %vm1082_vm3, %v446_v0, -inf  ;;  %v564_v11 = vrot.slane %v558_v62, 1 }
  0x56   : > { %390 = vmax.xlane.f32.xlu1 %v389_v32  ;;  %327 = vmax.xlane.f32.xlu0 %v326_v44  ;;  %v501_v10 = vmax.f32 %v489_v53, %v495_v1  ;;  %v573_v12 = vrot.slane %v558_v62, 2  ;;  %v461_v14 = vsel %vm180_vm1, %v456_v63, -inf  ;;  %v458_v15 = vsel %vm180_vm1, %v455_v9, -inf }
  0x57   : > { %v454_v16 = vrot.slane %v442_v5, %v1072_v6  ;;  %v511_v17 = vmax.f32 %v502_v7, %v505_v61  ;;  %v524_v18 = vsel %vm1082_vm3, %v515_v3, -inf  ;;  %v570_v20 = vmax.f32 %v558_v62, %v564_v11 }
  0x58   : > { %v510_v19 = vmax.f32 %v501_v10, %v504_v2  ;;  %v563_v21 = vrot.slane %v557_v8, 1  ;;  %v572_v26 = vrot.slane %v557_v8, 2  ;;  %v632_v27 = vrot.slane %v626_v13, 1 }
  0x59   : > { %v457_v24 = vsel %vm1082_vm3, %v454_v16, -inf  ;;  %v523_v25 = vrot.slane %v511_v17, %v1072_v6  ;;  %v579_v29 = vmax.f32 %v570_v20, %v573_v12  ;;  %v527_v31 = vsel %vm180_vm1, %v524_v18, -inf }
  0x5a   : > { %396 = vmax.xlane.f32.xlu1 %v395_v49  ;;  %393 = vmax.xlane.f32.xlu0 %v392_v54  ;;  %v519_v28 = vrot.slane %v510_v19, %v1072_v6  ;;  %v569_v30 = vmax.f32 %v557_v8, %v563_v21  ;;  %v638_v32 = vmax.f32 %v626_v13, %v632_v27  ;;  %v641_v33 = vrot.slane %v626_v13, 2 }
  0x5b   : > { %v565_v34 = vrot.slane %v559_v22, 1  ;;  %v464_v36 = vsel %vm180_vm1, %v457_v24, -inf  ;;  %v526_v37 = vsel %vm1082_vm3, %v523_v25, -inf  ;;  %v588_v38 = vrot.slane %v579_v29, %v1072_v6 }
  0x5c   : > { %v578_v39 = vmax.f32 %v569_v30, %v572_v26  ;;  %v525_v41 = vsel %vm1082_vm3, %v519_v28, -inf  ;;  %v647_v42 = vmax.f32 %v638_v32, %v641_v33  ;;  %v574_v44 = vrot.slane %v559_v22, 2 }
  0x5d   : > { %v571_v43 = vmax.f32 %v559_v22, %v565_v34  ;;  %v634_v46 = vrot.slane %v628_v35, 1  ;;  %v643_v47 = vrot.slane %v628_v35, 2  ;;  %v533_v48 = vsel %vm180_vm1, %v526_v37, -inf }
  0x5e   : > { %462 = vmax.xlane.f32.xlu1 %v461_v14  ;;  %459 = vmax.xlane.f32.xlu0 %v458_v15  ;;  %v584_v45 = vrot.slane %v578_v39, %v1072_v6  ;;  %v633_v50 = vrot.slane %v627_v40, 1  ;;  %v530_v51 = vsel %vm180_vm1, %v525_v41, -inf  ;;  %v594_v52 = vsel %vm1082_vm3, %v588_v38, -inf }
  0x5f   : > { %v580_v49 = vmax.f32 %v571_v43, %v574_v44  ;;  %v640_v53 = vmax.f32 %v628_v35, %v634_v46  ;;  %v642_v54 = vrot.slane %v627_v40, 2  ;;  %v653_v56 = vrot.slane %v647_v42, %v1072_v6 }
  0x60   : > { %v593_v55 = vsel %vm1082_vm3, %v584_v45, -inf  ;;  %v639_v58 = vmax.f32 %v627_v40, %v633_v50  ;;  %v599_v61 = vsel %vm180_vm1, %v594_v52, -inf  ;;  %vm208_vm4 = vcmask 57344  }
  0x61   : > { %v592_v57 = vrot.slane %v580_v49, %v1072_v6  ;;  %v649_v59 = vmax.f32 %v640_v53, %v643_v47  ;;  %v596_v62 = vsel %vm180_vm1, %v593_v55, -inf  ;;  %v662_v63 = vsel %vm1082_vm3, %v653_v56, -inf }
  0x62   : > { %528 = vmax.xlane.f32.xlu1 %v527_v31  ;;  %465 = vmax.xlane.f32.xlu0 %v464_v36  ;;  %v648_v60 = vmax.f32 %v639_v58, %v642_v54  ;;  %v665_v3 = vsel %vm180_vm1, %v662_v63, -inf }
  0x63   : > { %v595_v0 = vsel %vm1082_vm3, %v592_v57, -inf  ;;  %v661_v1 = vrot.slane %v649_v59, %v1072_v6 }
  0x64   : > { %v657_v2 = vrot.slane %v648_v60, %v1072_v6  ;;  %v602_v5 = vsel %vm180_vm1, %v595_v0, -inf }
  0x65   : > { %v664_v7 = vsel %vm1082_vm3, %v661_v1, -inf }
  0x66   : > { %534 = vmax.xlane.f32.xlu1 %v533_v48  ;;  %531 = vmax.xlane.f32.xlu0 %v530_v51  ;;  %v663_v8 = vsel %vm1082_vm3, %v657_v2, -inf  ;;  %v671_v9 = vsel %vm180_vm1, %v664_v7, -inf }
  0x67   : > { %v668_v10 = vsel %vm180_vm1, %v663_v8, -inf }
  0x6a   : > { %600 = vmax.xlane.f32.xlu1 %v599_v61  ;;  %597 = vmax.xlane.f32.xlu0 %v596_v62 }
  0x6e   : > { %666 = vmax.xlane.f32.xlu1 %v665_v3  ;;  %603 = vmax.xlane.f32.xlu0 %v602_v5 }
  0x72   : > { %672 = vmax.xlane.f32.xlu1 %v671_v9  ;;  %669 = vmax.xlane.f32.xlu0 %v668_v10 }
  0xd3   : > { %v189_v6 = vpop.xlane.xlu1 %188  ;;  %v183_v11 = vpop.xlane.xlu0 %182 }
  0xd4   : > { %v204_v12 = vrot.slane %v189_v6, %v1070_v4  ;;  %v196_v13 = vrot.slane %v183_v11, %v1070_v4 }
  0xd6   : > { %211 = vst.msk [vmem:[%s1202_s24 + $0x10] sm:$0x1] %vm208_vm4, %v204_v12  ;;  %209 = vst.msk [vmem:[%s1202_s24] sm:$0x1] %vm208_vm4, %v196_v13 }
  0xd7   : > { %v253_v23 = vpop.xlane.xlu1 %252  ;;  %v186_v14 = vpop.xlane.xlu0 %185 }
  0xd8   : > { %v266_v15 = vrot.slane %v253_v23, %v1070_v4  ;;  %v200_v16 = vrot.slane %v186_v14, %v1070_v4 }
  0xda   : > { %278 = vst.msk [vmem:[%s1202_s24 + $0x1] sm:$0x1] %vm208_vm4, %v266_v15  ;;  %210 = vst.msk [vmem:[%s1202_s24 + $0x8] sm:$0x1] %vm208_vm4, %v200_v16 }
  0xdb   : > { %v259_v17 = vpop.xlane.xlu1 %258  ;;  %v256_v18 = vpop.xlane.xlu0 %255 }
  0xdc   : > { %v274_v19 = vrot.slane %v259_v17, %v1070_v4  ;;  %v270_v20 = vrot.slane %v256_v18, %v1070_v4 }
  0xde   : > { %280 = vst.msk [vmem:[%s1202_s24 + $0x11] sm:$0x1] %vm208_vm4, %v274_v19  ;;  %279 = vst.msk [vmem:[%s1202_s24 + $0x9] sm:$0x1] %vm208_vm4, %v270_v20 }
  0xdf   : > { %v325_v21 = vpop.xlane.xlu1 %324  ;;  %v322_v22 = vpop.xlane.xlu0 %321 }
  0xe0   : > { %v339_v24 = vrot.slane %v325_v21, %v1070_v4  ;;  %v335_v25 = vrot.slane %v322_v22, %v1070_v4 }
  0xe2   : > { %348 = vst.msk [vmem:[%s1202_s24 + $0xa] sm:$0x1] %vm208_vm4, %v339_v24  ;;  %347 = vst.msk [vmem:[%s1202_s24 + $0x2] sm:$0x1] %vm208_vm4, %v335_v25 }
  0xe3   : > { %v391_v26 = vpop.xlane.xlu1 %390  ;;  %v328_v27 = vpop.xlane.xlu0 %327 }
  0xe4   : > { %v404_v28 = vrot.slane %v391_v26, %v1070_v4  ;;  %v343_v29 = vrot.slane %v328_v27, %v1070_v4 }
  0xe6   : > { %416 = vst.msk [vmem:[%s1202_s24 + $0x3] sm:$0x1] %vm208_vm4, %v404_v28  ;;  %349 = vst.msk [vmem:[%s1202_s24 + $0x12] sm:$0x1] %vm208_vm4, %v343_v29 }
  0xe7   : > { %v397_v30 = vpop.xlane.xlu1 %396  ;;  %v394_v31 = vpop.xlane.xlu0 %393 }
  0xe8   : > { %v412_v32 = vrot.slane %v397_v30, %v1070_v4  ;;  %v408_v33 = vrot.slane %v394_v31, %v1070_v4 }
  0xea   : > { %418 = vst.msk [vmem:[%s1202_s24 + $0x13] sm:$0x1] %vm208_vm4, %v412_v32  ;;  %417 = vst.msk [vmem:[%s1202_s24 + $0xb] sm:$0x1] %vm208_vm4, %v408_v33 }
  0xeb   : > { %v463_v34 = vpop.xlane.xlu1 %462  ;;  %v460_v35 = vpop.xlane.xlu0 %459 }
  0xec   : > { %v477_v36 = vrot.slane %v463_v34, %v1070_v4  ;;  %v473_v37 = vrot.slane %v460_v35, %v1070_v4 }
  0xee   : > { %486 = vst.msk [vmem:[%s1202_s24 + $0xc] sm:$0x1] %vm208_vm4, %v477_v36  ;;  %485 = vst.msk [vmem:[%s1202_s24 + $0x4] sm:$0x1] %vm208_vm4, %v473_v37 }
  0xef   : > { %v529_v38 = vpop.xlane.xlu1 %528  ;;  %v466_v39 = vpop.xlane.xlu0 %465 }
  0xf0   : > { %v542_v40 = vrot.slane %v529_v38, %v1070_v4  ;;  %v481_v41 = vrot.slane %v466_v39, %v1070_v4 }
  0xf2   : > { %554 = vst.msk [vmem:[%s1202_s24 + $0x5] sm:$0x1] %vm208_vm4, %v542_v40  ;;  %487 = vst.msk [vmem:[%s1202_s24 + $0x14] sm:$0x1] %vm208_vm4, %v481_v41 }
  0xf3   : > { %v535_v42 = vpop.xlane.xlu1 %534  ;;  %v532_v43 = vpop.xlane.xlu0 %531 }
  0xf4   : > { %v550_v44 = vrot.slane %v535_v42, %v1070_v4  ;;  %v546_v45 = vrot.slane %v532_v43, %v1070_v4 }
  0xf6   : > { %556 = vst.msk [vmem:[%s1202_s24 + $0x15] sm:$0x1] %vm208_vm4, %v550_v44  ;;  %555 = vst.msk [vmem:[%s1202_s24 + $0xd] sm:$0x1] %vm208_vm4, %v546_v45 }
  0xf7   : > { %v601_v46 = vpop.xlane.xlu1 %600  ;;  %v598_v47 = vpop.xlane.xlu0 %597 }
  0xf8   : > { %v615_v48 = vrot.slane %v601_v46, %v1070_v4  ;;  %v611_v49 = vrot.slane %v598_v47, %v1070_v4 }
  0xfa   : > { %624 = vst.msk [vmem:[%s1202_s24 + $0xe] sm:$0x1] %vm208_vm4, %v615_v48  ;;  %623 = vst.msk [vmem:[%s1202_s24 + $0x6] sm:$0x1] %vm208_vm4, %v611_v49 }
  0xfb   : > { %v667_v50 = vpop.xlane.xlu1 %666  ;;  %v604_v51 = vpop.xlane.xlu0 %603 }
  0xfc   : > { %v680_v52 = vrot.slane %v667_v50, %v1070_v4  ;;  %v619_v53 = vrot.slane %v604_v51, %v1070_v4 }
  0xfe   : > { %692 = vst.msk [vmem:[%s1202_s24 + $0x7] sm:$0x1] %vm208_vm4, %v680_v52  ;;  %625 = vst.msk [vmem:[%s1202_s24 + $0x16] sm:$0x1] %vm208_vm4, %v619_v53 }
  0xff   : > { %v673_v54 = vpop.xlane.xlu1 %672  ;;  %v670_v55 = vpop.xlane.xlu0 %669 }
 0x100   : > { %v688_v56 = vrot.slane %v673_v54, %v1070_v4  ;;  %v684_v57 = vrot.slane %v670_v55, %v1070_v4 }
 0x102   : > { %694 = vst.msk [vmem:[%s1202_s24 + $0x17] sm:$0x1] %vm208_vm4, %v688_v56  ;;  %693 = vst.msk [vmem:[%s1202_s24 + $0xf] sm:$0x1] %vm208_vm4, %v684_v57 }
 0x103   : > { %892 = shalt.err (!%p889_p1)
}
 0x104   : > { %s893_s13 = scalar_lea.hbm %s1273_s2, 384  ;;  %s897_s20 = scalar_lea.hbm %s1325_s1, 3072 }
 0x105   : > { %p894_p3 = scmp.ne.s32.totalorder %s1273_s2, %s893_s13  ;;  %p898_p0 = scmp.lt.u32.totalorder %s1273_s2, %s1325_s1 }
 0x106   : > { %p899_p2 = scmp.lt.u32.totalorder %s897_s20, %s893_s13  ;;  %p901_p6 = scmp.lt.u32.totalorder %s893_s13, %s1273_s2 }
 0x107   : > { %p895_p4 = pnand %p894_p3, %p1333_p10 }
 0x108   : > { %p900_p7 = por %p899_p2, %p898_p0 }
 0x109   : > { %p896_p5 = pneg %p895_p4 }
 0x10a   : > { %p902_p11 = por %p901_p6, %p900_p7 }
 0x10c   : > { %p903_p12 = pnand %p902_p11, %p896_p5 }
 0x10e   : > { %906 = shalt.err (!%p903_p12)
}
 0x10f   : > { %s951_s26 = smov 128   ;;  %s952_s29 = smov 8  }
 0x110   : > { %801 = dma.vmem_to_hbm [thread:$0]  (%p1333_p10), %s1275_s27, 384, %s1273_s2, %s696_s10, %s951_s26, %s951_s26, %s952_s29  }
 0x111 PF: > { %p812_p8 = scmp.ge.s32.totalorder %s945_s9, 2  ;;  %s724_s16 = sand.u32 1, %s933_s6  }
 0x112   : > { %p1334_p9 = scmp.ne.s32.totalorder %s1329_s18, 0  ;;  %s725_s24 = scalar_lea.sflag [#allocation4], %s724_s16 }
 0x114   : > { %p808_p13 = pnand %p812_p8, %p1334_p9 }
 0x116   : > { %928 = dma.done.wait (!%p808_p13), %s725_s24, 384  }
 0x117   : > { %930 = vsyncadd (!%p808_p13), %s725_s24, 4294966912  ;;  %p14_p1 = scmp.ge.s32.totalorder %s988_s12, 10   ;;  %s1335_s6 = smov %s937_s7 }
 0x118   : > { %s1336_s7 = smov %s941_s8  ;;  %s1337_s8 = smov %s1000_s15 }
 0x119   : > { %s1338_s9 = smov %s988_s12  ;;  %16 = sbr.rel (!%p14_p1) target bundleno = 5 (0x5), region = 69 }
 0x120   :  { %730 = vsyncpa [#allocation3], 1 }
 0x121   :  { %732 = vsyncpa [#allocation3 + $0x1], 1 }
 0x122   :  { %733 = vsyncpa [#allocation4], 1 }
 0x123   :  { %735 = vsyncpa [#allocation4 + $0x1], 1 }

</bundles_post_ra>
